<compile_context>
chip_gen: v6e
topology: v6e:2x2x1
jax: 0.10.0
libtpu: 0.0.40
codegen_flags: <defaults>
</compile_context>

<pallas_src>
import functools
from typing import NamedTuple

import jax
import jax.numpy as jnp
from jax import lax
from jax.experimental import pallas as pl
from jax.experimental.pallas import tpu as pltpu

_LANES = 128     # lane width of a vreg (last-dim alignment target)
_SUBLANES = 8    # sublane multiple for the second-to-last block dim
_NEG_BIG = -1e30 # finite "-inf" for the pad-mask (avoids inf-inf NaN paths)


def _round_up(x, m):
    return ((x + m - 1) // m) * m


class PreparedClassifier(NamedTuple):
    weight: jax.Array    # (out_pad, in_fea), matmul dtype, zero-padded rows
    col_mask: jax.Array  # (1, out_pad) f32: 0 for real classes, -1e30 for pad
    out_fea: int
    out_pad: int


def prepare_classifier_weight(weight, matmul_dtype=jnp.bfloat16):
    """One-time weight preprocessing, hoisted out of the per-call path.

    Pads the class dim to a lane-dense multiple of 128, casts to the MXU
    dtype, and precomputes the additive pad-mask row.  Call once per weight
    update; reuse the result for every forward call.
    """
    out_fea, in_fea = weight.shape
    out_pad = _round_up(out_fea, _LANES)
    w_pad = jnp.pad(weight, ((0, out_pad - out_fea), (0, 0))).astype(matmul_dtype)
    col = jnp.arange(out_pad, dtype=jnp.int32)[None, :]
    col_mask = jnp.where(col < out_fea, 0.0, _NEG_BIG).astype(jnp.float32)
    return PreparedClassifier(w_pad, col_mask, out_fea, out_pad)


def _classifier_kernel(x_ref, w_ref, mask_ref, o_ref, *, apply_mask):
    # x_ref    : (TN, in_fea)      VMEM — one batch tile, already matmul dtype
    # w_ref    : (out_pad, in_fea) VMEM — weight, resident across grid steps
    # mask_ref : (1, out_pad)      VMEM — additive pad mask, resident
    # o_ref    : (TN, out_pad)     VMEM — lane-dense f32 output tile
    logits = lax.dot_general(
        x_ref[...], w_ref[...],
        dimension_numbers=(((1,), (1,)), ((), ())),   # contract over in_fea
        preferred_element_type=jnp.float32,
    )  # (TN, out_pad) f32

    if apply_mask:  # static guard: compiled out when out_fea % 128 == 0
        logits = logits + mask_ref[...]

    # Numerically-stable log_softmax over dim=1 (classes), in f32.
    m = jnp.max(logits, axis=1, keepdims=True)
    z = logits - m
    lse = jnp.log(jnp.sum(jnp.exp(z), axis=1, keepdims=True))
    o_ref[...] = (z - lse).astype(o_ref.dtype)


def classifier_forward(features, prepared: PreparedClassifier, *,
                       block_n=1024,
                       vmem_limit_bytes=32 * 1024 * 1024,
                       trim_padding=True):
    """log_softmax(features @ weight.T, axis=1), fused in one Pallas kernel.

    `prepared` comes from prepare_classifier_weight (pad + cast done once).
    Pass bf16 features to avoid the in-wrapper cast copy on the hot path.
    """
    n, in_fea = features.shape
    w_pad, col_mask, out_fea, out_pad = prepared
    assert w_pad.shape[1] == in_fea, "feature/weight in_fea mismatch"

    matmul_dtype = w_pad.dtype
    if features.dtype != matmul_dtype:
        # HBM-bound kernel: bf16 x halves the dominant DMA.  Producing bf16
        # upstream skips this extra copy entirely.
        features = features.astype(matmul_dtype)

    x_bytes = jnp.dtype(matmul_dtype).itemsize
    w_bytes = jnp.dtype(matmul_dtype).itemsize

    # Largest batch tile that fits the 32 MiB scoped-VMEM budget (safe on all
    # of v5e/v6e/v7x): 2x double-buffered x + out tiles, plus the resident
    # weight and mask, plus 2 MiB slack.
    fixed_bytes = out_pad * in_fea * w_bytes + out_pad * 4
    per_row_bytes = 2 * in_fea * x_bytes + 2 * out_pad * 4
    budget = vmem_limit_bytes - fixed_bytes - (2 << 20)
    tn_cap = max(_SUBLANES, (budget // per_row_bytes) // _SUBLANES * _SUBLANES)

    tn = min(_round_up(block_n, _SUBLANES), tn_cap, _round_up(n, _SUBLANES))
    if n > _SUBLANES:
        # Keep >=2 grid steps whenever possible so dimension_semantics
        # ("parallel",) can shard the batch across v7x's two TensorCores
        # (negligible cost on single-TC v5e/v6e).
        tn = min(tn, _round_up(pl.cdiv(n, 2), _SUBLANES))
    tn = max(tn, _SUBLANES)

    grid = (pl.cdiv(n, tn),)
    kernel = functools.partial(_classifier_kernel,
                               apply_mask=(out_pad != out_fea))

    out_padded = pl.pallas_call(
        kernel,
        out_shape=jax.ShapeDtypeStruct((n, out_pad), jnp.float32),
        grid=grid,
        in_specs=[
            # batch-tiled activations: double-buffered by Pallas
            pl.BlockSpec((tn, in_fea), lambda i: (i, 0)),
            # weight: same block index every step -> stays resident in VMEM
            pl.BlockSpec((out_pad, in_fea), lambda i: (0, 0)),
            # tiny additive pad-mask row, also resident
            pl.BlockSpec((1, out_pad), lambda i: (0, 0)),
        ],
        out_specs=pl.BlockSpec((tn, out_pad), lambda i: (i, 0)),
        compiler_params=pltpu.CompilerParams(
            dimension_semantics=("parallel",),   # rows independent
            vmem_limit_bytes=vmem_limit_bytes,
        ),
    )(features, w_pad, col_mask)

    if trim_padding and out_pad != out_fea:
        # TODO(synk): consumers that can index the padded buffer directly
        # (e.g. a fused NLL gather) should pass trim_padding=False to skip
        # this extra HBM copy; columns >= out_fea then hold ~-1e30 garbage.
        return out_padded[:, :out_fea]
    return out_padded


def classifier_apply(features, weight, *, matmul_dtype=jnp.bfloat16, **kwargs):
    """Convenience path mirroring Classifier.forward with a raw weight."""
    return classifier_forward(
        features, prepare_classifier_weight(weight, matmul_dtype), **kwargs)


if __name__ == "__main__":
    # Small, module-consistent shapes: batch=8, in_fea=32, out_fea=16
    batch, in_fea, out_fea = 8, 32, 16

    key = jax.random.PRNGKey(0)
    k_x, k_w = jax.random.split(key)

    features = jax.random.normal(k_x, (batch, in_fea), dtype=jnp.float32)
    weight = jax.random.normal(k_w, (out_fea, in_fea), dtype=jnp.float32)

    # One-time weight preparation (outside the hot path), then forward.
    prepared = prepare_classifier_weight(weight)
    out = classifier_forward(features, prepared)
    out = jax.block_until_ready(out)
    assert out.shape == (batch, out_fea)

    # Primary check: reference using the same MXU dtype (bf16 operands,
    # f32 accumulation) -> tight tolerance.
    logits_bf = jnp.dot(features.astype(jnp.bfloat16),
                        weight.astype(jnp.bfloat16).T,
                        preferred_element_type=jnp.float32)
    ref_bf = jax.nn.log_softmax(logits_bf, axis=1)
    assert jnp.allclose(out, ref_bf, atol=1e-4, rtol=1e-4)

    # Sanity check vs. the full-f32 PyTorch semantics (only bf16 matmul
    # rounding separates them; generous tolerance).
    ref_f32 = jax.nn.log_softmax(features @ weight.T, axis=1)
    assert jnp.allclose(out, ref_f32, atol=2.5e-1, rtol=1e-1)

    print("KERNEL_OK")
</pallas_src>

<mosaic_0001>
module attributes {stable_mosaic.version = 11 : i64} {
  func.func @_classifier_kernel(%arg0: i32, %arg1: memref<8x32xbf16, #tpu.memory_space<vmem>>, %arg2: memref<128x32xbf16, #tpu.memory_space<vmem>>, %arg3: memref<1x128xf32, #tpu.memory_space<vmem>>, %arg4: memref<8x128xf32, #tpu.memory_space<vmem>>) attributes {dimension_semantics = [#tpu.dimension_semantics<parallel>], iteration_bounds = array<i64: 1>, scalar_prefetch = 0 : i64, scratch_operands = 0 : i64, tpu.core_type = #tpu.core_type<tc>, window_params = [{transform_indices = @transform_0, window_bounds = array<i64: 8, 32>}, {pipeline_mode = #tpu.pipeline_mode<synchronous>, transform_indices = @transform_1, window_bounds = array<i64: 128, 32>}, {pipeline_mode = #tpu.pipeline_mode<synchronous>, transform_indices = @transform_2, window_bounds = array<i64: 1, 128>}, {transform_indices = @transform_3, window_bounds = array<i64: 8, 128>}]} {
    %c0 = arith.constant 0 : index
    %c0_0 = arith.constant 0 : index
    %0 = vector.load %arg1[%c0, %c0_0] : memref<8x32xbf16, #tpu.memory_space<vmem>>, vector<8x32xbf16>
    %c0_1 = arith.constant 0 : index
    %c0_2 = arith.constant 0 : index
    %1 = vector.load %arg2[%c0_1, %c0_2] : memref<128x32xbf16, #tpu.memory_space<vmem>>, vector<128x32xbf16>
    %cst = arith.constant dense<0.000000e+00> : vector<8x128xf32>
    %2 = tpu.matmul %0, %1, %cst {dimension_numbers = #tpu.dot_dimension_numbers<[1], [1], [0], [0], [0, 0, 1, 0], [], []>} : vector<8x32xbf16>, vector<128x32xbf16>, vector<8x128xf32> -> vector<8x128xf32>
    %c0_3 = arith.constant 0 : index
    %c0_4 = arith.constant 0 : index
    %3 = vector.load %arg3[%c0_3, %c0_4] : memref<1x128xf32, #tpu.memory_space<vmem>>, vector<1x128xf32>
    %4 = vector.broadcast %3 : vector<1x128xf32> to vector<8x128xf32>
    %5 = arith.addf %2, %4 : vector<8x128xf32>
    %cst_5 = arith.constant dense<0xFF800000> : vector<8xf32>
    %6 = vector.multi_reduction <maximumf>, %5, %cst_5 [1] : vector<8x128xf32> to vector<8xf32>
    %7 = vector.shape_cast %6 : vector<8xf32> to vector<8x1xf32>
    %8 = vector.broadcast %7 : vector<8x1xf32> to vector<8x128xf32>
    %9 = arith.subf %5, %8 : vector<8x128xf32>
    %10 = math.exp %9 : vector<8x128xf32>
    %cst_6 = arith.constant dense<0.000000e+00> : vector<8xf32>
    %11 = vector.multi_reduction <add>, %10, %cst_6 [1] : vector<8x128xf32> to vector<8xf32>
    %12 = vector.shape_cast %11 : vector<8xf32> to vector<8x1xf32>
    %13 = math.log %12 : vector<8x1xf32>
    %14 = vector.broadcast %13 : vector<8x1xf32> to vector<8x128xf32>
    %15 = arith.subf %9, %14 : vector<8x128xf32>
    %c0_7 = arith.constant 0 : index
    %c0_8 = arith.constant 0 : index
    %16 = vector.load %arg4[%c0_7, %c0_8] : memref<8x128xf32, #tpu.memory_space<vmem>>, vector<8x128xf32>
    tpu.vector_store %arg4[%c0_7, %c0_8], %15 {strides = array<i32>} : memref<8x128xf32, #tpu.memory_space<vmem>>, vector<8x128xf32>,
    return
  }
  func.func @transform_0(%arg0: i32) -> (i32, i32) {
    %c0_i32 = arith.constant 0 : i32
    %c0_i32_0 = arith.constant 0 : i32
    return %arg0, %c0_i32 : i32, i32
  }
  func.func @transform_1(%arg0: i32) -> (i32, i32) {
    %c0_i32 = arith.constant 0 : i32
    %c0_i32_0 = arith.constant 0 : i32
    %c0_i32_1 = arith.constant 0 : i32
    return %c0_i32, %c0_i32_0 : i32, i32
  }
  func.func @transform_2(%arg0: i32) -> (i32, i32) {
    %c0_i32 = arith.constant 0 : i32
    %c0_i32_0 = arith.constant 0 : i32
    %c0_i32_1 = arith.constant 0 : i32
    return %c0_i32, %c0_i32_0 : i32, i32
  }
  func.func @transform_3(%arg0: i32) -> (i32, i32) {
    %c0_i32 = arith.constant 0 : i32
    %c0_i32_0 = arith.constant 0 : i32
    return %arg0, %c0_i32 : i32, i32
  }
}

</mosaic_0001>

<bundles_post_ra>
// kernel: tpu_custom_call.1
= control target key start
LH: loop header
LB: loop body
LE: loop exit
PB: predicated region body
PF: predicated region fallthrough
CT: control target
= control target key end

     0   :  { %v249_v1 = vmov 0.0   ;;  %vm80_vm0 = vcmask 261120   ;;  %vm250_vm1 = vmmov 0   ;;  %s314_s0 = inlined_call_operand.vmem [shape: bf16[8,32], index: 0, kind: input, shape index: {}]   ;;  %s315_s1 = inlined_call_operand.vmem [shape: bf16[128,32], index: 1, kind: input, shape index: {}]   ;;  %s316_s2 = inlined_call_operand.vmem [shape: f32[1,128], index: 2, kind: input, shape index: {}]   ;;  %s317_s3 = inlined_call_operand.hbm [shape: f32[8,128], index: 3, kind: output, shape index: {}]  }
   0x1   :  { %v215_v0 = vld [vmem:[%s315_s1 + $0x38] sm:$0xff]   ;;  %192 = vmatprep.subr.bf16.mxu0 %v249_v1  ;;  %v216_v3 = vld [vmem:[%s315_s1 + $0x30] sm:$0xff]   ;;  %208 = vmatprep.mubr.msk.bf16.mxu0 %vm250_vm1, %v249_v1 }
   0x2   :  { %v106_v2 = vsel %vm80_vm0, %v215_v0, 0  ;;  %v103_v4 = vsel %vm80_vm0, %v216_v3, 0 }
   0x3   :  { %193 = vmatpush3.bf16.xpose.msra.mxu0 %v106_v2 }
   0x4   :  { %194 = vmatprep.subr.bf16.mxu0 %v249_v1 }
   0x5   :  { %8 = vsyncpa [#allocation3], 0  ;;  %v217_v5 = vld [vmem:[%s315_s1 + $0x28] sm:$0xff]   ;;  %v218_v7 = vld [vmem:[%s315_s1 + $0x20] sm:$0xff]  }
   0x6   :  { %v100_v6 = vsel %vm80_vm0, %v217_v5, 0  ;;  %v97_v8 = vsel %vm80_vm0, %v218_v7, 0  ;;  %v219_v9 = vld [vmem:[%s315_s1 + $0x18] sm:$0xff]   ;;  %v220_v11 = vld [vmem:[%s315_s1 + $0x10] sm:$0xff]   ;;  %v221_v13 = vld [vmem:[%s315_s1 + $0x8] sm:$0xff]  }
   0x7   :  { %v94_v10 = vsel %vm80_vm0, %v219_v9, 0  ;;  %v91_v12 = vsel %vm80_vm0, %v220_v11, 0  ;;  %v88_v14 = vsel %vm80_vm0, %v221_v13, 0  ;;  %v222_v15 = vld [vmem:[%s315_s1] sm:$0xff]  }
   0x8   :  { %v85_v16 = vsel %vm80_vm0, %v222_v15, 0  ;;  %v16_v17 = vld [vmem:[%s314_s0] sm:$0xf]  ;;  %s251_s0 = smov [#allocation2]  }
   0x9   :  { %v173_v18 = vld [vmem:[%s316_s2] ss:$0 sm:$0xff]  ;;  %s165_s1 = sshll.u32 %s251_s0, 4  ;;  %s166_s1 = int_to_ptr.vmem [resolvable:$true] %s165_s1 }
   0xa   :  { %s227_s2 = scalar_lea.vmem %s166_s1, 128  ;;  %p232_p1 = scmp.lt.s32.totalorder %s166_s1, %s166_s1 }
   0xb   :  { %195 = vmatpush3.bf16.xpose.msra.mxu0 %v103_v4  ;;  %p228_p0 = scmp.ne.s32.totalorder %s166_s1, %s227_s2  ;;  %p233_p2 = scmp.lt.s32.totalorder %s227_s2, %s227_s2 }
   0xc   :  { %196 = vmatprep.subr.bf16.mxu0 %v249_v1 }
   0xd   :  { %p234_p3 = por %p233_p2, %p232_p1 }
   0xf   :  { %p235_p4 = pnand %p234_p3, %p228_p0 }
  0x13   :  { %197 = vmatpush3.bf16.xpose.msra.mxu0 %v100_v6 }
  0x14   :  { %198 = vmatprep.subr.bf16.mxu0 %v249_v1 }
  0x1b   :  { %199 = vmatpush3.bf16.xpose.msra.mxu0 %v97_v8 }
  0x1c   :  { %200 = vmatprep.subr.bf16.mxu0 %v249_v1 }
  0x23   :  { %201 = vmatpush3.bf16.xpose.msra.mxu0 %v94_v10 }
  0x24   :  { %202 = vmatprep.subr.bf16.mxu0 %v249_v1 }
  0x2b   :  { %203 = vmatpush3.bf16.xpose.msra.mxu0 %v91_v12 }
  0x2c   :  { %204 = vmatprep.subr.bf16.mxu0 %v249_v1 }
  0x33   :  { %205 = vmatpush3.bf16.xpose.msra.mxu0 %v88_v14 }
  0x34   :  { %206 = vmatprep.subr.bf16.mxu0 %v249_v1 }
  0x3b   :  { %207 = vmatpush3.bf16.xpose.msra.mxu0 %v85_v16 }
  0x42   :  { %209 = vmatmul.mubr.msk.bf16.vlgmr.msra.gmra.mxu0 %vm80_vm0, %v16_v17 }
 0x102   :  { %v142_v19 = vpop.f32.mrf.mxu0 }
 0x103   :  { %v143_v20 = vadd.f32 %v173_v18, %v142_v19 }
 0x104   :  { %v210_v21 = vpop.f32.mrf.mxu0 }
 0x105   :  { %148 = vmax.xlane.f32.xlu0 %v143_v20 }
 0x106   :  { %v145_v22 = vpop.f32.mrf.mxu0 }
 0x108   :  { %v211_v23 = vpop.f32.mrf.mxu0 }
 0x18e   :  { %v149_v24 = vpop.xlane.xlu0 %148 }
 0x18f   :  { %v150_v25 = vsub.f32 %v143_v20, %v149_v24 }
 0x191   :  { %v151_v26 = vmul.f32 1.442695, %v150_v25 }
 0x193   :  { %223 = vpow2.f32 %v151_v26 }
 0x1a0   :  { %v224_v27 = vpop.eup %223 }
 0x1a1   :  { %153 = vadd.xlane.f32.xlu0 %v224_v27 }
 0x22a   :  { %v154_v28 = vpop.xlane.xlu0 %153 }
 0x22b   :  { %225 = vlog2.f32 %v154_v28 }
 0x238   :  { %v226_v29 = vpop.eup %225 }
 0x239   :  { %v156_v30 = vmul.f32 0.6931472, %v226_v29 }
 0x23b   :  { %v157_v31 = vsub.f32 %v150_v25, %v156_v30 }
 0x23d   :  { %158 = vst [vmem:[#allocation2] sm:$0xff] %v157_v31 }
 0x23e   :  { %238 = shalt.err (!%p235_p4)
}
 0x23f   :  { %168 = dma.vmem_to_hbm [thread:$0]  %s166_s1, 128, %s317_s3, [#allocation3]  }
 0x240   :  { %247 = dma.done.wait [#allocation3], 128  }
 0x241   :  { %248 = vsyncadd [#allocation3], 4294967168 }
 0x242   :  { %172 = vsyncpa [#allocation3], 1 }

</bundles_post_ra>
